<compile_context>
chip_gen: v6e
topology: v6e:2x2x1
jax: 0.10.0
libtpu: 0.0.40
codegen_flags: <defaults>
</compile_context>

<pallas_src>
import jax
import jax.numpy as jnp
from jax.experimental import pallas as pl
from jax.experimental.pallas import tpu as pltpu


def _round_up(x: int, m: int) -> int:
    return ((x + m - 1) // m) * m


def _make_listall_loss_kernel(M: float):
    inv_M = float(1.0 / M)
    eps = 1e-9

    def kernel(pred_ref, label_ref, o_ref):
        # (TILE_B, C) tiles; class axis is the last (lane) axis.
        x = pred_ref[...].astype(jnp.float32) * inv_M
        lab = label_ref[...].astype(jnp.float32)

        # Numerically stable softmax pieces; per-row values hoisted as (TB, 1).
        m = jnp.max(x, axis=-1, keepdims=True)             # (TB, 1)  XLU
        e = jnp.exp(x - m)                                  # (TB, C)  EUP: 1 exp/elem
        denom = jnp.sum(e, axis=-1, keepdims=True)          # (TB, 1)  XLU

        # log(e/denom + eps) == log(e + eps*denom) - log(denom)   (no per-elem divide)
        log_num = jnp.log(e + eps * denom)                  # (TB, C)  EUP: 1 log/elem
        log_denom = jnp.log(denom)                           # (TB, 1)  per-row only
        lab_rowsum = jnp.sum(lab, axis=-1, keepdims=True)     # (TB, 1)  XLU

        partial = jnp.sum(lab * log_num) - jnp.sum(lab_rowsum * log_denom)
        o_ref[...] = jnp.reshape(-partial, (1, 1, 1))

    return kernel


def list_all_loss(y_pred: jax.Array, y_label: jax.Array, M: float = 0.5,
                  tile_b: int | None = None) -> jax.Array:
    """Pallas implementation of ListAllLoss.forward for 2-D inputs (B, C)."""
    assert y_pred.shape == y_label.shape and y_pred.ndim == 2
    B, C = y_pred.shape

    if tile_b is None:
        # 2 inputs x 2 pipeline buffers x tile_b x C x 4B (+ f32 temps in-kernel)
        # must stay well under the v7x default scoped-VMEM budget (32 MiB of
        # 64 MiB physical) -> leave generous headroom.
        budget_bytes = 12 * 1024 * 1024
        per_row_bytes = 2 * 2 * max(C, 1) * 4
        tile_b = max(8, min(1024, (budget_bytes // per_row_bytes) // 8 * 8))
    tile_b = int(min(tile_b, _round_up(B, 8)))
    tile_b = _round_up(tile_b, 8)          # sublane-aligned second-to-last block dim

    num_tiles = (B + tile_b - 1) // tile_b
    B_pad = num_tiles * tile_b
    if B_pad != B:
        pad = B_pad - B
        # Zero labels => padded rows contribute exactly 0; zero preds stay finite.
        y_pred = jnp.pad(y_pred, ((0, pad), (0, 0)))
        y_label = jnp.pad(y_label, ((0, pad), (0, 0)))

    partials = pl.pallas_call(
        _make_listall_loss_kernel(M),
        out_shape=jax.ShapeDtypeStruct((num_tiles, 1, 1), jnp.float32),
        grid=(num_tiles,),
        in_specs=[
            pl.BlockSpec((tile_b, C), lambda i: (i, 0)),
            pl.BlockSpec((tile_b, C), lambda i: (i, 0)),
        ],
        out_specs=pl.BlockSpec((1, 1, 1), lambda i: (i, 0, 0)),
        compiler_params=pltpu.CompilerParams(
            dimension_semantics=("parallel",),   # independent partials -> megacore OK
        ),
        cost_estimate=pl.CostEstimate(
            flops=6 * B_pad * C,
            transcendentals=2 * B_pad * C,            # exp + log per element
            bytes_accessed=2 * 4 * B_pad * C + 4 * num_tiles,
        ),
    )(y_pred, y_label)

    # Tiny final reduction over per-tile partials.
    return jnp.sum(partials)


def _reference(y_pred, y_label, M=0.5):
    x = y_pred.astype(jnp.float32) / M
    p = jax.nn.softmax(x, axis=1) + 1e-9
    return jnp.mean(-jnp.sum(y_label.astype(jnp.float32) * jnp.log(p)))


if __name__ == "__main__":
    key = jax.random.PRNGKey(0)
    k1, k2 = jax.random.split(key)

    # Small demo shapes: batch=13 (non-multiple of tile -> exercises padding),
    # classes=128 (lane-dense class axis).
    B, C = 13, 128
    y_pred = jax.random.normal(k1, (B, C), dtype=jnp.float32)
    # Soft per-row label distribution (rows sum to 1), like a listwise relevance target.
    y_label = jax.nn.softmax(jax.random.normal(k2, (B, C), dtype=jnp.float32), axis=1)

    loss = list_all_loss(y_pred, y_label, M=0.5, tile_b=8)  # 2 grid tiles
    loss = jax.block_until_ready(loss)

    ref = _reference(y_pred, y_label, M=0.5)
    assert jnp.allclose(loss, ref, rtol=1e-5, atol=1e-4), (loss, ref)

    print("KERNEL_OK")
</pallas_src>

<mosaic_0001>
module attributes {stable_mosaic.version = 11 : i64} {
  func.func @kernel(%arg0: i32, %arg1: memref<8x128xf32, #tpu.memory_space<vmem>>, %arg2: memref<8x128xf32, #tpu.memory_space<vmem>>, %arg3: memref<1x1x1xf32, #tpu.memory_space<vmem>>) attributes {dimension_semantics = [#tpu.dimension_semantics<parallel>], iteration_bounds = array<i64: 2>, scalar_prefetch = 0 : i64, scratch_operands = 0 : i64, tpu.core_type = #tpu.core_type<tc>, window_params = [{transform_indices = @transform_0, window_bounds = array<i64: 8, 128>}, {transform_indices = @transform_1, window_bounds = array<i64: 8, 128>}, {transform_indices = @transform_2, window_bounds = array<i64: 1, 1, 1>}]} {
    %c0 = arith.constant 0 : index
    %c0_0 = arith.constant 0 : index
    %0 = vector.load %arg1[%c0, %c0_0] : memref<8x128xf32, #tpu.memory_space<vmem>>, vector<8x128xf32>
    %cst = arith.constant 2.000000e+00 : f32
    %1 = vector.broadcast %cst : f32 to vector<8x128xf32>
    %2 = arith.mulf %0, %1 : vector<8x128xf32>
    %c0_1 = arith.constant 0 : index
    %c0_2 = arith.constant 0 : index
    %3 = vector.load %arg2[%c0_1, %c0_2] : memref<8x128xf32, #tpu.memory_space<vmem>>, vector<8x128xf32>
    %cst_3 = arith.constant dense<0xFF800000> : vector<8xf32>
    %4 = vector.multi_reduction <maximumf>, %2, %cst_3 [1] : vector<8x128xf32> to vector<8xf32>
    %5 = vector.shape_cast %4 : vector<8xf32> to vector<8x1xf32>
    %6 = vector.broadcast %5 : vector<8x1xf32> to vector<8x128xf32>
    %7 = arith.subf %2, %6 : vector<8x128xf32>
    %8 = math.exp %7 : vector<8x128xf32>
    %cst_4 = arith.constant dense<0.000000e+00> : vector<8xf32>
    %9 = vector.multi_reduction <add>, %8, %cst_4 [1] : vector<8x128xf32> to vector<8xf32>
    %10 = vector.shape_cast %9 : vector<8xf32> to vector<8x1xf32>
    %cst_5 = arith.constant 9.99999971E-10 : f32
    %11 = vector.broadcast %cst_5 : f32 to vector<8x1xf32>
    %12 = arith.mulf %11, %10 : vector<8x1xf32>
    %13 = vector.broadcast %12 : vector<8x1xf32> to vector<8x128xf32>
    %14 = arith.addf %8, %13 : vector<8x128xf32>
    %15 = math.log %14 : vector<8x128xf32>
    %16 = math.log %10 : vector<8x1xf32>
    %cst_6 = arith.constant dense<0.000000e+00> : vector<8xf32>
    %17 = vector.multi_reduction <add>, %3, %cst_6 [1] : vector<8x128xf32> to vector<8xf32>
    %18 = vector.shape_cast %17 : vector<8xf32> to vector<8x1xf32>
    %19 = arith.mulf %3, %15 : vector<8x128xf32>
    %20 = vector.shape_cast %19 : vector<8x128xf32> to vector<1x8x128xf32>
    %cst_7 = arith.constant dense<0.000000e+00> : vector<1xf32>
    %21 = vector.multi_reduction <add>, %20, %cst_7 [1, 2] : vector<1x8x128xf32> to vector<1xf32>
    %22 = vector.shape_cast %21 : vector<1xf32> to vector<1x1x1xf32>
    %23 = vector.extract %22[0, 0, 0] : f32 from vector<1x1x1xf32>
    %24 = arith.mulf %18, %16 : vector<8x1xf32>
    %25 = vector.shape_cast %24 : vector<8x1xf32> to vector<1x8x1xf32>
    %cst_8 = arith.constant dense<0.000000e+00> : vector<1xf32>
    %26 = vector.multi_reduction <add>, %25, %cst_8 [1, 2] : vector<1x8x1xf32> to vector<1xf32>
    %27 = vector.shape_cast %26 : vector<1xf32> to vector<1x1x1xf32>
    %28 = vector.extract %27[0, 0, 0] : f32 from vector<1x1x1xf32>
    %29 = arith.subf %23, %28 : f32
    %cst_9 = arith.constant 0.000000e+00 : f32
    %30 = arith.subf %cst_9, %29 : f32
    %31 = vector.broadcast %30 : f32 to vector<1x1x1xf32>
    %c0_10 = arith.constant 0 : index
    %c0_11 = arith.constant 0 : index
    %c0_12 = arith.constant 0 : index
    %32 = vector.load %arg3[%c0_10, %c0_11, %c0_12] : memref<1x1x1xf32, #tpu.memory_space<vmem>>, vector<1x1x1xf32>
    tpu.vector_store %arg3[%c0_10, %c0_11, %c0_12], %31 {strides = array<i32>} : memref<1x1x1xf32, #tpu.memory_space<vmem>>, vector<1x1x1xf32>,
    return
  }
  func.func @transform_0(%arg0: i32) -> (i32, i32) {
    %c0_i32 = arith.constant 0 : i32
    %c0_i32_0 = arith.constant 0 : i32
    return %arg0, %c0_i32 : i32, i32
  }
  func.func @transform_1(%arg0: i32) -> (i32, i32) {
    %c0_i32 = arith.constant 0 : i32
    %c0_i32_0 = arith.constant 0 : i32
    return %arg0, %c0_i32 : i32, i32
  }
  func.func @transform_2(%arg0: i32) -> (i32, i32, i32) {
    %c0_i32 = arith.constant 0 : i32
    %c0_i32_0 = arith.constant 0 : i32
    %c0_i32_1 = arith.constant 0 : i32
    return %arg0, %c0_i32, %c0_i32_0 : i32, i32, i32
  }
}

</mosaic_0001>

<bundles_post_ra>
// kernel: tpu_custom_call.1
= control target key start
LH: loop header
LB: loop body
LE: loop exit
PB: predicated region body
PF: predicated region fallthrough
CT: control target
= control target key end

     0   :  { %7 = vsyncpa [#allocation3], 0  ;;  %s652_s0 = inlined_call_operand.hbm [shape: f32[16,128], index: 0, kind: input, shape index: {}]   ;;  %s653_s1 = inlined_call_operand.hbm [shape: f32[16,128], index: 1, kind: input, shape index: {}]   ;;  %s654_s2 = inlined_call_operand.vmem [shape: f32[2,1,1], index: 2, kind: output, shape index: {}]  }
   0x1   :  { %9 = vsyncpa [#allocation3 + $0x1], 0 }
   0x2   :  { %10 = vsyncpa [#allocation5], 0 }
   0x3   :  { %12 = vsyncpa [#allocation5 + $0x1], 0  ;;  %s500_s9 = smov 0   ;;  %s502_s10 = smov 0  }
   0x4   :  { %s504_s11 = smov 0   ;;  %s506_s12 = smov 0  }
   0x5 LB: > { %s519_s13 = sadd.s32 4294967295, %s481_s12   ;;  %s522_s14 = sadd.s32 1, %s481_s12   ;;  %s481_s12 = sphi %s506_s12, %s666_s12   ;;  %s477_s11 = sphi %s504_s11, %s665_s11   ;;  %s473_s10 = sphi %s502_s10, %s664_s10   ;;  %s469_s9 = sphi %s500_s9, %s663_s9  }
   0x6   : > { %s22_s15 = ssub.s32 %s481_s12, %s522_s14  ;;  %s25_s16 = sadd.s32 1, %s477_s11 }
   0x7   : > { %p23_p0 = scmp.eq.s32.totalorder %s22_s15, 0  ;;  %p32_p1 = scmp.ne.s32.totalorder %s477_s11, %s473_s10 }
   0x8   : > { %p33_p2 = scmp.eq.s32.totalorder %s481_s12, 0  ;;  %p38_p3 = scmp.ne.s32.totalorder %s473_s10, %s469_s9 }
   0x9   : > { %s532_s17 = scalar_select %p23_p0, %s477_s11, %s25_s16  }
   0xa   : > { %p34_p4 = por %p33_p2, %p32_p1  ;;  %p39_p5 = scmp.eq.s32.totalorder %s519_s13, 0 }
   0xb   : > { %p348_p6 = scmp.lt.s32.totalorder %s481_s12, 2  ;;  %s541_s19 = sand.u32 1, %s477_s11  }
   0xc   : > { %p536_p7 = por %p39_p5, %p38_p3  ;;  %s324_s20 = sshll.u32 %s541_s19, 3 }
   0xd   : > { %s325_s21 = sshll.u32 %s481_s12, 7  ;;  %s118_s25 = scalar_lea.vmem [#allocation2], %s324_s20 }
   0xe   : > { %s656_s18 = scalar_select %p536_p7, 1, 0 }
   0xf   : > { %s550_s24 = scalar_lea.hbm %s652_s0, %s325_s21  ;;  %s125_s26 = sshll.u32 %s118_s25, 4  ;;  %s554_s26 = int_to_ptr.vmem [resolvable:$true] %s125_s26 }
  0x10   : > { %p556_p8 = pnand %p348_p6, %p34_p4  ;;  %s115_s28 = scalar_lea.sflag [#allocation3], %s541_s19 }
  0x11   : > { %s387_s29 = scalar_lea.hbm %s550_s24, 128  ;;  %s392_s4 = scalar_lea.hbm %s652_s0, 256 }
  0x12   : > { %p388_p11 = scmp.ne.s32.totalorder %s550_s24, %s387_s29  ;;  %p389_p12 = pneg %p556_p8 }
  0x13   : > { %p393_p1 = scmp.lt.s32.totalorder %s550_s24, %s652_s0  ;;  %p394_p2 = scmp.lt.s32.totalorder %s392_s4, %s387_s29 }
  0x14   : > { %p390_p13 = pnand %p389_p12, %p388_p11 }
  0x15   : > { %p395_p3 = por %p394_p2, %p393_p1 }
  0x16   : > { %p391_p0 = pneg %p390_p13 }
  0x18   : > { %p396_p4 = pnand %p395_p3, %p391_p0 }
  0x1a   : > { %399 = shalt.err (!%p396_p4)
}
  0x1b   : > { %s400_s7 = scalar_lea.vmem %s554_s26, 128  ;;  %s483_s8 = smov [#allocation2]  }
  0x1c   : > { %p401_p5 = scmp.ne.s32.totalorder %s554_s26, %s400_s7  ;;  %s405_s9 = sshll.u32 %s483_s8, 4  ;;  %s406_s9 = int_to_ptr.vmem [resolvable:$false] %s405_s9 }
  0x1d   : > { %s407_s15 = scalar_lea.vmem %s406_s9, 256  ;;  %p408_p13 = scmp.lt.s32.totalorder %s554_s26, %s406_s9 }
  0x1e   : > { %p403_p6 = pnand %p401_p5, %p389_p12  ;;  %p409_p9 = scmp.lt.s32.totalorder %s407_s15, %s400_s7 }
  0x20   : > { %p404_p11 = pneg %p403_p6  ;;  %p410_p10 = por %p409_p9, %p408_p13 }
  0x22   : > { %p411_p1 = pnand %p410_p10, %p404_p11 }
  0x24   : > { %414 = shalt.err (!%p411_p1)
}
  0x25   : > { %344 = dma.hbm_to_vmem [thread:$0]  (!%p556_p8), %s550_s24, 128, %s554_s26, %s115_s28  }
  0x26   : > { %p658_p0 = scmp.lt.s32.totalorder %s481_s12, 3  ;;  %p659_p2 = scmp.ge.s32.totalorder %s481_s12, 1 }
  0x27   : > { %s600_s25 = scalar_lea.hbm %s653_s1, %s325_s21  ;;  %s136_s29 = scalar_lea.vmem [#allocation4], %s324_s20 }
  0x28   : > { %p591_p3 = pnand %p659_p2, %p658_p0  ;;  %s143_s30 = sshll.u32 %s136_s29, 4  ;;  %s144_s30 = int_to_ptr.vmem [resolvable:$true] %s143_s30 }
  0x29   : > { %s133_s24 = scalar_lea.sflag [#allocation5], %s541_s19  ;;  %s415_s26 = scalar_lea.hbm %s600_s25, 128 }
  0x2a   : > { %s660_s16 = scalar_select %p591_p3, 1, 0 }
  0x2b   : > { %p416_p9 = scmp.ne.s32.totalorder %s600_s25, %s415_s26  ;;  %s420_s3 = scalar_lea.hbm %s653_s1, 256 }
  0x2c   : > { %p421_p5 = scmp.lt.s32.totalorder %s600_s25, %s653_s1  ;;  %p422_p6 = scmp.lt.s32.totalorder %s420_s3, %s415_s26 }
  0x2d   : > { %p418_p10 = pnand %p416_p9, %p389_p12 }
  0x2e   : > { %p423_p11 = por %p422_p6, %p421_p5 }
  0x2f   : > { %p419_p4 = pneg %p418_p10 }
  0x31   : > { %p424_p13 = pnand %p423_p11, %p419_p4 }
  0x33   : > { %427 = shalt.err (!%p424_p13)
}
  0x34   : > { %s428_s20 = scalar_lea.vmem %s144_s30, 128  ;;  %s484_s19 = smov [#allocation4]  }
  0x35   : > { %p429_p1 = scmp.ne.s32.totalorder %s144_s30, %s428_s20  ;;  %s433_s5 = sshll.u32 %s484_s19, 4  ;;  %s434_s5 = int_to_ptr.vmem [resolvable:$false] %s433_s5 }
  0x36   : > { %s435_s6 = scalar_lea.vmem %s434_s5, 256  ;;  %p436_p9 = scmp.lt.s32.totalorder %s144_s30, %s434_s5 }
  0x37   : > { %p431_p0 = pnand %p429_p1, %p389_p12  ;;  %p437_p10 = scmp.lt.s32.totalorder %s435_s6, %s428_s20 }
  0x39   : > { %p432_p2 = pneg %p431_p0  ;;  %p438_p7 = por %p437_p10, %p436_p9 }
  0x3b   : > { %p439_p3 = pnand %p438_p7, %p432_p2 }
  0x3d   : > { %442 = shalt.err (!%p439_p3)
}
  0x3e   : > { %347 = dma.hbm_to_vmem [thread:$0]  (!%p556_p8), %s600_s25, 128, %s144_s30, %s133_s24  }
  0x3f   : > { %p661_p4 = scmp.ne.s32.totalorder %s660_s16, 0 }
  0x40   : > { %s154_s7 = sand.u32 (!%p661_p4), 1, %s473_s10   ;;  %p662_p12 = scmp.ne.s32.totalorder (!%p661_p4), %s656_s18, 0 }
  0x41   : > { %152 = sbr.rel (%p661_p4) target bundleno = 599 (0x257), region = 28  ;;  %s329_s8 = sshll.u32 (!%p661_p4), %s154_s7, 3 }
  0x42   : > { %s155_s9 = scalar_lea.sflag (!%p661_p4), [#allocation3], %s154_s7  ;;  %s158_s15 = scalar_lea.vmem (!%p661_p4), [#allocation2], %s329_s8 }
  0x46   : > { %460 = dma.done.wait (%p662_p12), %s155_s9, 128  }
  0x47   : > { %462 = vsyncadd (%p662_p12), %s155_s9, 4294967168  ;;  %s164_s22 = scalar_lea.sflag [#allocation5], %s154_s7  ;;  %s167_s23 = scalar_lea.vmem [#allocation4], %s329_s8 }
  0x48   : > { %464 = dma.done.wait (%p662_p12), %s164_s22, 128  }
  0x49   : > { %466 = vsyncadd (%p662_p12), %s164_s22, 4294967168  ;;  %v194_v0 = vld [vmem:[%s158_s15] sm:$0xff]  ;;  %v196_v2 = vld [vmem:[%s167_s23] sm:$0xff]  ;;  %vm223_vm0 = vcmask 7168   ;;  %p191_p7 = scmp.lt.s32.totalorder %s519_s13, 1  ;;  %vm237_vm1 = vcmask 0  }
  0x4a   : > { %v195_v1 = vmul.f32 2.0, %v194_v0  ;;  %210 = vadd.xlane.f32.xlu1 %v196_v2 }
  0x4b   : > { %s668_s13 = smov (!%p191_p7, %s519_s13), 1 }
  0x4c   : > { %197 = vmax.xlane.f32.xlu0 %v195_v1  ;;  %s193_s30 = scalar_lea.vmem %s654_s2, %s668_s13 }
  0xd3   : > { %v211_v11 = vpop.xlane.xlu1 %210 }
  0xd5   : > { %v198_v3 = vpop.xlane.xlu0 %197 }
  0xd6   : > { %v199_v4 = vsub.f32 %v195_v1, %v198_v3 }
  0xd8   : > { %v200_v5 = vmul.f32 1.442695, %v199_v4 }
  0xda   : > { %381 = vpow2.f32 %v200_v5 }
  0xe7   : > { %v382_v6 = vpop.eup %381 }
  0xe8   : > { %202 = vadd.xlane.f32.xlu0 %v382_v6 }
 0x171   : > { %v203_v7 = vpop.xlane.xlu0 %202 }
 0x172   : > { %v204_v8 = vmul.f32 1e-09, %v203_v7  ;;  %383 = vlog2.f32 %v203_v7 }
 0x174   : > { %v205_v9 = vadd.f32 %v382_v6, %v204_v8 }
 0x176   : > { %385 = vlog2.f32 %v205_v9 }
 0x17f   : > { %v384_v10 = vpop.eup %383 }
 0x180   : > { %v209_v12 = vmul.f32 0.6931472, %v384_v10 }
 0x182   : > { %v222_v13 = vmul.f32 %v211_v11, %v209_v12 }
 0x183   : > { %v386_v14 = vpop.eup %385 }
 0x184   : > { %v224_v15 = vsel %vm223_vm0, %v222_v13, 0.0  ;;  %v207_v16 = vmul.f32 0.6931472, %v386_v14 }
 0x185   : > { %225 = vadd.xlane.f32.xlu0 %v224_v15 }
 0x186   : > { %v212_v17 = vmul.f32 %v207_v16, %v196_v2 }
 0x188   : > { %213 = vadd.xlane.f32.xlu1 %v212_v17 }
 0x20e   : > { %v226_v18 = vpop.xlane.xlu0 %225 }
 0x20f   : > { %v227_v19 = vrot.slane %v226_v18, 4 }
 0x211   : > { %v228_v20 = vadd.f32 %v227_v19, %v226_v18  ;;  %v214_v21 = vpop.xlane.xlu1 %213 }
 0x212   : > { %v215_v22 = vrot.slane %v214_v21, 4 }
 0x213   : > { %v229_v23 = vrot.slane %v228_v20, 2 }
 0x214   : > { %v216_v24 = vadd.f32 %v215_v22, %v214_v21 }
 0x215   : > { %v230_v25 = vadd.f32 %v229_v23, %v228_v20 }
 0x216   : > { %v217_v26 = vrot.slane %v216_v24, 2 }
 0x217   : > { %v231_v28 = vrot.slane %v230_v25, 1 }
 0x218   : > { %v218_v27 = vadd.f32 %v217_v26, %v216_v24 }
 0x219   : > { %v232_v31 = vadd.f32 %v231_v28, %v230_v25 }
 0x21a   : > { %v219_v29 = vrot.slane %v218_v27, 1 }
 0x21c   : > { %v220_v30 = vadd.f32 %v219_v29, %v218_v27 }
 0x21e   : > { %333 = vpush %v220_v30 }
 0x21f   : > { %335 = vpush %v232_v31 }
 0x24f   : > { %s334_s18 = spop %333 }
 0x250   : > { %s336_s27 = spop %335 }
 0x251   : > { %s234_s16 = ssub.f32 %s334_s18, %s336_s27 }
 0x253   : > { %s235_s24 = ssub.f32 0.0, %s234_s16 }
 0x255   : > { %v236_v32 = vstv %s235_s24 }
 0x256   : > { %238 = vst.msk [vmem:[%s193_s30] sm:$0x1] %vm237_vm1, %v236_v32 }
 0x257 PF: > { %p15_p8 = scmp.ge.s32.totalorder %s522_s14, 4   ;;  %s663_s9 = smov %s473_s10 }
 0x258   : > { %s664_s10 = smov %s477_s11  ;;  %s665_s11 = smov %s532_s17 }
 0x259   : > { %s666_s12 = smov %s522_s14  ;;  %17 = sbr.rel (!%p15_p8) target bundleno = 5 (0x5), region = 81 }
 0x25e   :  { %256 = vsyncpa [#allocation3], 1 }
 0x25f   :  { %258 = vsyncpa [#allocation3 + $0x1], 1 }
 0x260   :  { %259 = vsyncpa [#allocation5], 1 }
 0x261   :  { %261 = vsyncpa [#allocation5 + $0x1], 1 }

</bundles_post_ra>
